<compile_context>
chip_gen: v7x
topology: tpu7x:2x2x1
jax: 0.10.0
libtpu: 0.0.40
codegen_flags: <defaults>
</compile_context>

<pallas_src>
import math

import jax
import jax.numpy as jnp
from jax.experimental import pallas as pl
from jax.experimental.pallas import tpu as pltpu


def _cq_attention_kernel(c_ref, q_ref, cmask_ref, qmask_ref, w_ref, o_ref):
    # c_ref:     (1, d, Lc)   context, channels-first
    # q_ref:     (1, d, Lq)   question, channels-first
    # cmask_ref: (1, Lc, 1)
    # qmask_ref: (1, 1, Lq)
    # w_ref:     (d, 4)       columns: [w4C, w4Q, w4mlu, bias(bcast)]
    # o_ref:     (1, 4d, Lc)  rows: [C ; A^T ; C*A^T ; C*B^T]
    d = c_ref.shape[1]

    Cf = c_ref[0].astype(jnp.float32)          # (d, Lc)
    Qf = q_ref[0].astype(jnp.float32)          # (d, Lq)
    cm = cmask_ref[0].astype(jnp.float32)      # (Lc, 1)
    qm = qmask_ref[0].astype(jnp.float32)      # (1, Lq)

    w4c = w_ref[:, 0:1].astype(jnp.float32)    # (d, 1)
    w4q = w_ref[:, 1:2].astype(jnp.float32)    # (d, 1)
    w4m = w_ref[:, 2:3].astype(jnp.float32)    # (d, 1)
    bias = w_ref[0:1, 3:4].astype(jnp.float32)  # (1, 1)

    # Trilinear similarity with subres0 folded into the matmul:
    #   S[l,q] = sum_c C[c,l]*(w4mlu[c]*Q[c,q] + w4C[c])
    #          + sum_c w4Q[c]*Q[c,q] + bias
    q_hat = Qf * w4m + w4c                                          # (d, Lq)
    tn = (((0,), (0,)), ((), ()))                                   # A^T · B
    s_cq = jax.lax.dot_general(Cf, q_hat, tn,
                               preferred_element_type=jnp.float32)  # (Lc, Lq)
    q_row = jnp.sum(Qf * w4q, axis=0, keepdims=True)                # (1, Lq)
    S = s_cq + q_row + bias                                         # (Lc, Lq)

    neg = jnp.float32(-1e30)
    S1 = jax.nn.softmax(S * qm + (1.0 - qm) * neg, axis=1)          # over Lq
    S2 = jax.nn.softmax(S * cm + (1.0 - cm) * neg, axis=0)          # over Lc

    nt = (((1,), (1,)), ((), ()))                                   # A · B^T
    At = jax.lax.dot_general(Qf, S1, nt,
                             preferred_element_type=jnp.float32)    # (d, Lc) = A^T
    CS2 = jnp.dot(Cf, S2, preferred_element_type=jnp.float32)       # (d, Lq)
    Bt = jax.lax.dot_general(CS2, S1, nt,
                             preferred_element_type=jnp.float32)    # (d, Lc) = B^T

    out = jnp.concatenate([Cf, At, Cf * At, Cf * Bt], axis=0)       # (4d, Lc)
    o_ref[0] = out.astype(o_ref.dtype)


def cq_attention_forward(C, Q, Cmask, Qmask, w4C, w4Q, w4mlu, bias):
    """C: (B, d, Lc), Q: (B, d, Lq), Cmask: (B, Lc), Qmask: (B, Lq).
       w4C/w4Q/w4mlu: (d,) (or any shape with d elements), bias: scalar.
       Returns (B, 4*d, Lc) matching CQAttention.forward (eval mode)."""
    B, d, Lc = C.shape
    Lq = Q.shape[2]
    out_dtype = C.dtype

    bias_f = jnp.asarray(bias, jnp.float32).reshape(())
    W = jnp.stack(
        [jnp.asarray(w4C, jnp.float32).reshape(d),
         jnp.asarray(w4Q, jnp.float32).reshape(d),
         jnp.asarray(w4mlu, jnp.float32).reshape(d),
         jnp.full((d,), bias_f, jnp.float32)],
        axis=1)                                            # (d, 4)

    Cmask_col = Cmask.astype(jnp.float32).reshape(B, Lc, 1)
    Qmask_row = Qmask.astype(jnp.float32).reshape(B, 1, Lq)

    return pl.pallas_call(
        _cq_attention_kernel,
        out_shape=jax.ShapeDtypeStruct((B, 4 * d, Lc), out_dtype),
        grid_spec=pltpu.PrefetchScalarGridSpec(
            num_scalar_prefetch=0,
            grid=(B,),
            in_specs=[
                pl.BlockSpec((1, d, Lc), lambda b: (b, 0, 0)),   # C (native layout)
                pl.BlockSpec((1, d, Lq), lambda b: (b, 0, 0)),   # Q (native layout)
                pl.BlockSpec((1, Lc, 1), lambda b: (b, 0, 0)),   # Cmask as column
                pl.BlockSpec((1, 1, Lq), lambda b: (b, 0, 0)),   # Qmask as row
                pl.BlockSpec((d, 4), lambda b: (0, 0)),          # params, VMEM-resident
            ],
            out_specs=pl.BlockSpec((1, 4 * d, Lc), lambda b: (b, 0, 0)),
        ),
        compiler_params=pltpu.CompilerParams(
            dimension_semantics=("parallel",)),
    )(C, Q, Cmask_col, Qmask_row, W)


if __name__ == "__main__":
    key = jax.random.PRNGKey(0)
    B, d_model, Lc, Lq = 2, 32, 16, 12

    k = jax.random.split(key, 7)
    C = jax.random.normal(k[0], (B, d_model, Lc), dtype=jnp.float32)
    Q = jax.random.normal(k[1], (B, d_model, Lq), dtype=jnp.float32)
    Cmask = (jax.random.uniform(k[2], (B, Lc)) > 0.25).astype(jnp.float32)
    Qmask = (jax.random.uniform(k[3], (B, Lq)) > 0.25).astype(jnp.float32)
    Cmask = Cmask.at[:, 0].set(1.0)
    Qmask = Qmask.at[:, 0].set(1.0)

    lim = math.sqrt(1.0 / d_model)
    w4C = jax.random.uniform(k[4], (d_model,), jnp.float32, -lim, lim)
    w4Q = jax.random.uniform(k[5], (d_model,), jnp.float32, -lim, lim)
    w4mlu = jax.random.uniform(k[6], (d_model,), jnp.float32, -lim, lim)
    bias = jnp.float32(0.05)

    out = cq_attention_forward(C, Q, Cmask, Qmask, w4C, w4Q, w4mlu, bias)
    jax.block_until_ready(out)

    # ----- pure-JAX reference, mirroring the PyTorch code path -----
    def mask_logits(t, m):
        return t * m + (1.0 - m) * (-1e30)

    Ct = jnp.transpose(C, (0, 2, 1))                                  # (B, Lc, d)
    Qt = jnp.transpose(Q, (0, 2, 1))                                  # (B, Lq, d)
    subres0 = jnp.einsum('bld,d->bl', Ct, w4C)[:, :, None]            # (B, Lc, 1)
    subres1 = jnp.einsum('bqd,d->bq', Qt, w4Q)[:, None, :]            # (B, 1, Lq)
    subres2 = jnp.einsum('bld,bqd->blq', Ct * w4mlu[None, None, :], Qt)
    S = subres0 + subres1 + subres2 + bias                            # (B, Lc, Lq)
    S1 = jax.nn.softmax(mask_logits(S, Qmask[:, None, :]), axis=2)
    S2 = jax.nn.softmax(mask_logits(S, Cmask[:, :, None]), axis=1)
    A = jnp.einsum('blq,bqd->bld', S1, Qt)                            # (B, Lc, d)
    S1S2T = jnp.einsum('blq,bkq->blk', S1, S2)                        # (B, Lc, Lc)
    Bm = jnp.einsum('blk,bkd->bld', S1S2T, Ct)                        # (B, Lc, d)
    ref = jnp.concatenate([Ct, A, Ct * A, Ct * Bm], axis=2)           # (B, Lc, 4d)
    ref = jnp.transpose(ref, (0, 2, 1))                               # (B, 4d, Lc)

    assert out.shape == ref.shape, (out.shape, ref.shape)
    assert jnp.allclose(out, ref, rtol=1e-4, atol=1e-4), (
        "max abs diff", float(jnp.max(jnp.abs(out - ref))))

    print("KERNEL_OK")
</pallas_src>

<mosaic_0001>
module attributes {stable_mosaic.version = 11 : i64} {
  func.func @_cq_attention_kernel(%arg0: i32, %arg1: memref<1x32x16xf32, #tpu.memory_space<vmem>>, %arg2: memref<1x32x12xf32, #tpu.memory_space<vmem>>, %arg3: memref<1x16x1xf32, #tpu.memory_space<vmem>>, %arg4: memref<1x1x12xf32, #tpu.memory_space<vmem>>, %arg5: memref<32x4xf32, #tpu.memory_space<vmem>>, %arg6: memref<1x128x16xf32, #tpu.memory_space<vmem>>) attributes {dimension_semantics = [#tpu.dimension_semantics<parallel>], iteration_bounds = array<i64: 2>, scalar_prefetch = 0 : i64, scratch_operands = 0 : i64, tpu.core_type = #tpu.core_type<tc>, window_params = [{transform_indices = @transform_0, window_bounds = array<i64: 1, 32, 16>}, {transform_indices = @transform_1, window_bounds = array<i64: 1, 32, 12>}, {transform_indices = @transform_2, window_bounds = array<i64: 1, 16, 1>}, {transform_indices = @transform_3, window_bounds = array<i64: 1, 1, 12>}, {pipeline_mode = #tpu.pipeline_mode<synchronous>, transform_indices = @transform_4, window_bounds = array<i64: 32, 4>}, {transform_indices = @transform_5, window_bounds = array<i64: 1, 128, 16>}]} {
    %c0 = arith.constant 0 : index
    %c0_0 = arith.constant 0 : index
    %c0_1 = arith.constant 0 : index
    %0 = vector.load %arg1[%c0, %c0_0, %c0_1] : memref<1x32x16xf32, #tpu.memory_space<vmem>>, vector<1x32x16xf32>
    %1 = vector.shape_cast %0 : vector<1x32x16xf32> to vector<32x16xf32>
    %c0_2 = arith.constant 0 : index
    %c0_3 = arith.constant 0 : index
    %c0_4 = arith.constant 0 : index
    %2 = vector.load %arg2[%c0_2, %c0_3, %c0_4] : memref<1x32x12xf32, #tpu.memory_space<vmem>>, vector<1x32x12xf32>
    %3 = vector.shape_cast %2 : vector<1x32x12xf32> to vector<32x12xf32>
    %c0_5 = arith.constant 0 : index
    %c0_6 = arith.constant 0 : index
    %c0_7 = arith.constant 0 : index
    %4 = vector.load %arg3[%c0_5, %c0_6, %c0_7] : memref<1x16x1xf32, #tpu.memory_space<vmem>>, vector<1x16x1xf32>
    %5 = vector.shape_cast %4 : vector<1x16x1xf32> to vector<16x1xf32>
    %c0_8 = arith.constant 0 : index
    %c0_9 = arith.constant 0 : index
    %c0_10 = arith.constant 0 : index
    %6 = vector.load %arg4[%c0_8, %c0_9, %c0_10] : memref<1x1x12xf32, #tpu.memory_space<vmem>>, vector<1x1x12xf32>
    %7 = vector.shape_cast %6 : vector<1x1x12xf32> to vector<1x12xf32>
    %c0_11 = arith.constant 0 : index
    %c0_12 = arith.constant 0 : index
    %8 = vector.load %arg5[%c0_11, %c0_12] : memref<32x4xf32, #tpu.memory_space<vmem>>, vector<32x1xf32>
    %c0_13 = arith.constant 0 : index
    %c1 = arith.constant 1 : index
    %9 = vector.load %arg5[%c0_13, %c1] : memref<32x4xf32, #tpu.memory_space<vmem>>, vector<32x1xf32>
    %c0_14 = arith.constant 0 : index
    %c2 = arith.constant 2 : index
    %10 = vector.load %arg5[%c0_14, %c2] : memref<32x4xf32, #tpu.memory_space<vmem>>, vector<32x1xf32>
    %c0_15 = arith.constant 0 : index
    %c3 = arith.constant 3 : index
    %11 = vector.load %arg5[%c0_15, %c3] : memref<32x4xf32, #tpu.memory_space<vmem>>, vector<1x1xf32>
    %12 = vector.broadcast %10 : vector<32x1xf32> to vector<32x12xf32>
    %13 = arith.mulf %3, %12 : vector<32x12xf32>
    %14 = vector.broadcast %8 : vector<32x1xf32> to vector<32x12xf32>
    %15 = arith.addf %13, %14 : vector<32x12xf32>
    %cst = arith.constant dense<0.000000e+00> : vector<16x12xf32>
    %16 = tpu.matmul %1, %15, %cst {dimension_numbers = #tpu.dot_dimension_numbers<[0], [0], [1], [1], [0, 1, 1, 1], [], []>} : vector<32x16xf32>, vector<32x12xf32>, vector<16x12xf32> -> vector<16x12xf32>
    %17 = vector.broadcast %9 : vector<32x1xf32> to vector<32x12xf32>
    %18 = arith.mulf %3, %17 : vector<32x12xf32>
    %cst_16 = arith.constant dense<0.000000e+00> : vector<12xf32>
    %19 = vector.multi_reduction <add>, %18, %cst_16 [0] : vector<32x12xf32> to vector<12xf32>
    %20 = vector.shape_cast %19 : vector<12xf32> to vector<1x12xf32>
    %21 = vector.broadcast %20 : vector<1x12xf32> to vector<16x12xf32>
    %22 = arith.addf %16, %21 : vector<16x12xf32>
    %23 = vector.broadcast %11 : vector<1x1xf32> to vector<16x12xf32>
    %24 = arith.addf %22, %23 : vector<16x12xf32>
    %25 = vector.broadcast %7 : vector<1x12xf32> to vector<16x12xf32>
    %26 = arith.mulf %24, %25 : vector<16x12xf32>
    %cst_17 = arith.constant 1.000000e+00 : f32
    %27 = vector.broadcast %cst_17 : f32 to vector<1x12xf32>
    %28 = arith.subf %27, %7 : vector<1x12xf32>
    %cst_18 = arith.constant -1.000000e+30 : f32
    %29 = vector.broadcast %cst_18 : f32 to vector<1x12xf32>
    %30 = arith.mulf %28, %29 : vector<1x12xf32>
    %31 = vector.broadcast %30 : vector<1x12xf32> to vector<16x12xf32>
    %32 = arith.addf %26, %31 : vector<16x12xf32>
    %cst_19 = arith.constant dense<0xFF800000> : vector<16xf32>
    %33 = vector.multi_reduction <maximumf>, %32, %cst_19 [1] : vector<16x12xf32> to vector<16xf32>
    %cst_20 = arith.constant 0xFF800000 : f32
    %34 = vector.broadcast %cst_20 : f32 to vector<16xf32>
    %35 = arith.maximumf %34, %33 : vector<16xf32>
    %36 = vector.shape_cast %35 : vector<16xf32> to vector<16x1xf32>
    %37 = vector.broadcast %36 : vector<16x1xf32> to vector<16x12xf32>
    %38 = arith.subf %32, %37 : vector<16x12xf32>
    %39 = math.exp %38 : vector<16x12xf32>
    %cst_21 = arith.constant dense<0.000000e+00> : vector<16xf32>
    %40 = vector.multi_reduction <add>, %39, %cst_21 [1] : vector<16x12xf32> to vector<16xf32>
    %41 = vector.shape_cast %40 : vector<16xf32> to vector<16x1xf32>
    %42 = vector.broadcast %41 : vector<16x1xf32> to vector<16x12xf32>
    %43 = arith.divf %39, %42 : vector<16x12xf32>
    %44 = vector.broadcast %5 : vector<16x1xf32> to vector<16x12xf32>
    %45 = arith.mulf %24, %44 : vector<16x12xf32>
    %cst_22 = arith.constant 1.000000e+00 : f32
    %46 = vector.broadcast %cst_22 : f32 to vector<16x1xf32>
    %47 = arith.subf %46, %5 : vector<16x1xf32>
    %cst_23 = arith.constant -1.000000e+30 : f32
    %48 = vector.broadcast %cst_23 : f32 to vector<16x1xf32>
    %49 = arith.mulf %47, %48 : vector<16x1xf32>
    %50 = vector.broadcast %49 : vector<16x1xf32> to vector<16x12xf32>
    %51 = arith.addf %45, %50 : vector<16x12xf32>
    %cst_24 = arith.constant dense<0xFF800000> : vector<12xf32>
    %52 = vector.multi_reduction <maximumf>, %51, %cst_24 [0] : vector<16x12xf32> to vector<12xf32>
    %cst_25 = arith.constant 0xFF800000 : f32
    %53 = vector.broadcast %cst_25 : f32 to vector<12xf32>
    %54 = arith.maximumf %53, %52 : vector<12xf32>
    %55 = vector.shape_cast %54 : vector<12xf32> to vector<1x12xf32>
    %56 = vector.broadcast %55 : vector<1x12xf32> to vector<16x12xf32>
    %57 = arith.subf %51, %56 : vector<16x12xf32>
    %58 = math.exp %57 : vector<16x12xf32>
    %cst_26 = arith.constant dense<0.000000e+00> : vector<12xf32>
    %59 = vector.multi_reduction <add>, %58, %cst_26 [0] : vector<16x12xf32> to vector<12xf32>
    %60 = vector.shape_cast %59 : vector<12xf32> to vector<1x12xf32>
    %61 = vector.broadcast %60 : vector<1x12xf32> to vector<16x12xf32>
    %62 = arith.divf %58, %61 : vector<16x12xf32>
    %cst_27 = arith.constant dense<0.000000e+00> : vector<32x16xf32>
    %63 = tpu.matmul %3, %43, %cst_27 {dimension_numbers = #tpu.dot_dimension_numbers<[1], [1], [0], [0], [0, 0, 1, 0], [], []>} : vector<32x12xf32>, vector<16x12xf32>, vector<32x16xf32> -> vector<32x16xf32>
    %cst_28 = arith.constant dense<0.000000e+00> : vector<32x12xf32>
    %64 = tpu.matmul %1, %62, %cst_28 {dimension_numbers = #tpu.dot_dimension_numbers<[1], [0], [0], [1], [0, 0, 1, 1], [], []>} : vector<32x16xf32>, vector<16x12xf32>, vector<32x12xf32> -> vector<32x12xf32>
    %cst_29 = arith.constant dense<0.000000e+00> : vector<32x16xf32>
    %65 = tpu.matmul %64, %43, %cst_29 {dimension_numbers = #tpu.dot_dimension_numbers<[1], [1], [0], [0], [0, 0, 1, 0], [], []>} : vector<32x12xf32>, vector<16x12xf32>, vector<32x16xf32> -> vector<32x16xf32>
    %66 = arith.mulf %1, %63 : vector<32x16xf32>
    %67 = arith.mulf %1, %65 : vector<32x16xf32>
    %68 = tpu.concatenate %1, %63, %66, %67 in 0 : vector<32x16xf32>, vector<32x16xf32>, vector<32x16xf32>, vector<32x16xf32> -> vector<128x16xf32>
    %c0_30 = arith.constant 0 : index
    %c0_31 = arith.constant 0 : index
    %c0_32 = arith.constant 0 : index
    %69 = vector.load %arg6[%c0_30, %c0_31, %c0_32] : memref<1x128x16xf32, #tpu.memory_space<vmem>>, vector<1x128x16xf32>
    %70 = vector.shape_cast %69 : vector<1x128x16xf32> to vector<128x16xf32>
    %71 = vector.shape_cast %68 : vector<128x16xf32> to vector<1x128x16xf32>
    tpu.vector_store %arg6[%c0_30, %c0_31, %c0_32], %71 {strides = array<i32>} : memref<1x128x16xf32, #tpu.memory_space<vmem>>, vector<1x128x16xf32>,
    return
  }
  func.func @transform_0(%arg0: i32) -> (i32, i32, i32) {
    %c0_i32 = arith.constant 0 : i32
    %c0_i32_0 = arith.constant 0 : i32
    %c0_i32_1 = arith.constant 0 : i32
    return %arg0, %c0_i32, %c0_i32_0 : i32, i32, i32
  }
  func.func @transform_1(%arg0: i32) -> (i32, i32, i32) {
    %c0_i32 = arith.constant 0 : i32
    %c0_i32_0 = arith.constant 0 : i32
    %c0_i32_1 = arith.constant 0 : i32
    return %arg0, %c0_i32, %c0_i32_0 : i32, i32, i32
  }
  func.func @transform_2(%arg0: i32) -> (i32, i32, i32) {
    %c0_i32 = arith.constant 0 : i32
    %c0_i32_0 = arith.constant 0 : i32
    %c0_i32_1 = arith.constant 0 : i32
    return %arg0, %c0_i32, %c0_i32_0 : i32, i32, i32
  }
  func.func @transform_3(%arg0: i32) -> (i32, i32, i32) {
    %c0_i32 = arith.constant 0 : i32
    %c0_i32_0 = arith.constant 0 : i32
    %c0_i32_1 = arith.constant 0 : i32
    return %arg0, %c0_i32, %c0_i32_0 : i32, i32, i32
  }
  func.func @transform_4(%arg0: i32) -> (i32, i32) {
    %c0_i32 = arith.constant 0 : i32
    %c0_i32_0 = arith.constant 0 : i32
    %c0_i32_1 = arith.constant 0 : i32
    return %c0_i32, %c0_i32_0 : i32, i32
  }
  func.func @transform_5(%arg0: i32) -> (i32, i32, i32) {
    %c0_i32 = arith.constant 0 : i32
    %c0_i32_0 = arith.constant 0 : i32
    %c0_i32_1 = arith.constant 0 : i32
    return %arg0, %c0_i32, %c0_i32_0 : i32, i32, i32
  }
}

</mosaic_0001>

<bundles_post_ra>
// kernel: tpu_custom_call.1
= control target key start
LH: loop header
LB: loop body
LE: loop exit
PB: predicated region body
PF: predicated region fallthrough
CT: control target
= control target key end

     0   :  { %s1204_s18 = smov 0   ;;  %s1365_s0 = inlined_call_operand.vmem [shape: f32[2,32,16], index: 0, kind: input, shape index: {}]   ;;  %s1366_s1 = inlined_call_operand.vmem [shape: f32[2,32,12], index: 1, kind: input, shape index: {}]   ;;  %s1367_s2 = inlined_call_operand.vmem [shape: f32[2,16,1], index: 2, kind: input, shape index: {}]   ;;  %s1368_s3 = inlined_call_operand.vmem [shape: f32[2,1,12], index: 3, kind: input, shape index: {}]   ;;  %s1369_s4 = inlined_call_operand.vmem [shape: f32[32,4], index: 4, kind: input, shape index: {}]   ;;  %s1370_s5 = inlined_call_operand.vmem [shape: f32[2,128,16], index: 5, kind: output, shape index: {}]  }
   0x1 LB: > { %s1000_s19 = sadd.s32 4294967295, %s1168_s18   ;;  %p1004_p0 = scmp.ge.s32.totalorder %s1168_s18, 1  ;;  %s1168_s18 = sphi %s1204_s18, %s15_s18  }
   0x2   : > { %p215_p1 = scmp.lt.s32.totalorder %s1168_s18, 3 }
   0x4   : > { %p216_p2 = pnand %p1004_p0, %p215_p1 }
   0x5   : > { %v290_v0 = vld [vmem:[%s1369_s4] sm:$0xff] (!%p216_p2)  ;;  %p256_p3 = scmp.lt.s32.totalorder (!%p216_p2), %s1000_s19, 1  ;;  %v1170_v1 = vmov (!%p216_p2), 0   ;;  %v1171_v2 = vmov (!%p216_p2), 2   ;;  %v291_v3 = vld [vmem:[%s1369_s4 + $0x8] sm:$0xff] (!%p216_p2)  ;;  %vm693_vm0 = vcmask (!%p216_p2), 130048   ;;  %v496_v62 = vlaneseq (!%p216_p2) }
   0x6   : > { %219 = sbr.rel (%p216_p2) target bundleno = 972 (0x3cc), region = 40  ;;  %1142 = vset.pattern.permute.xlu1 (!%p216_p2), %v1170_v1  ;;  %1141 = vset.pattern.permute.xlu0 (!%p216_p2), %v1171_v2  ;;  %v292_v7 = vld [vmem:[%s1369_s4 + $0x10] sm:$0xff] (!%p216_p2)  ;;  %v293_v9 = vld [vmem:[%s1369_s4 + $0x18] sm:$0xff] (!%p216_p2)  ;;  %v294_v11 = vld [vmem:[%s1369_s4] sm:$0x1] (!%p216_p2)  ;;  %vm359_vm1 = vcmask (!%p216_p2), 97280  }
   0x7   : > { %320 = vperm.xlu1 (!%p216_p2), %1142, %v290_v0   ;;  %297 = vperm.xlu0 (!%p216_p2), %1141, %v290_v0   ;;  %s1172_s16 = smov (!%p216_p2), 125   ;;  %v1173_v12 = vmov (!%p216_p2), 1   ;;  %vm405_vm2 = vcmask (!%p216_p2), 261120   ;;  %vm1111_vm3 = vmpackc.low (!%p216_p2), %vm359_vm1, %vm359_vm1 }
   0xb   : > { %324 = vperm.xlu1 (!%p216_p2), %1142, %v291_v3   ;;  %302 = vperm.xlu0 (!%p216_p2), %1141, %v291_v3  }
   0xd   : > { %s1372_s19 = smov (!%p256_p3, %s1000_s19), 1 }
   0xe   : > { %s1033_s24 = sshll.u32 %s1372_s19, 5  ;;  %s1036_s25 = sshll.u32 %s1372_s19, 7 }
   0xf   : > { %s260_s28 = scalar_lea.vmem %s1365_s0, %s1033_s24  ;;  %s1228_s6 = scalar_lea.vmem %s1370_s5, %s1036_s25  ;;  %1143 = vset.pattern.permute.xlu1 %v1171_v2  ;;  %307 = vperm.xlu0 %1141, %v292_v7   ;;  %v497_v2 = vshrl.u32 %v496_v62, 7 }
  0x10   : > { %v1230_v4 = vld [vmem:[%s260_s28] sm:$0xff]  ;;  %v1232_v5 = vld [vmem:[%s260_s28 + $0x8] sm:$0xff]  ;;  %v1234_v6 = vld [vmem:[%s260_s28 + $0x10] sm:$0xff]  ;;  %312 = vperm.xlu1 %1143, %v293_v9   ;;  %s1260_s13 = scalar_lea.vmem %s1366_s1, %s1033_s24  ;;  %s1035_s17 = sshll.u32 %s1372_s19, 4 }
  0x11   : > { %896 = vst.msk [vmem:[%s1228_s6] sm:$0xff] %vm693_vm0, %v1230_v4  ;;  %897 = vst.msk [vmem:[%s1228_s6 + $0x8] sm:$0xff] %vm693_vm0, %v1232_v5  ;;  %v1248_v8 = vld [vmem:[%s260_s28 + $0x18] sm:$0xff]  ;;  %v1264_v10 = vld [vmem:[%s1260_s13] sm:$0xff]  ;;  %s270_s22 = scalar_lea.vmem %s1367_s2, %s1035_s17  ;;  %s273_s25 = scalar_lea.vmem %s1368_s3, %s1372_s19 }
  0x12   : > { %898 = vst.msk [vmem:[%s1228_s6 + $0x10] sm:$0xff] %vm693_vm0, %v1234_v6  ;;  %899 = vst.msk [vmem:[%s1228_s6 + $0x18] sm:$0xff] %vm693_vm0, %v1248_v8  ;;  %1076 = vmatprep.mubr.msk.f32.mxu1 %vm359_vm1, %v1264_v10  ;;  %v287_v13 = vld [vmem:[%s270_s22] sm:$0xff]  ;;  %v288_v15 = vld [vmem:[%s270_s22 + $0x8] sm:$0xff] }
  0x13   : > { %1144 = vset.pattern.permute.xlu0 %v1170_v1  ;;  %v547_v14 = vsub.f32 1.0, %v287_v13  ;;  %v548_v17 = vsub.f32 1.0, %v288_v15  ;;  %v1278_v21 = vld [vmem:[%s1260_s13 + $0x8] sm:$0xff]  ;;  %v1283_v28 = vld [vmem:[%s1260_s13 + $0x10] sm:$0xff]  ;;  %v1286_v32 = vld [vmem:[%s1260_s13 + $0x18] sm:$0xff] }
  0x14   : > { %1145 = vset.pattern.permute.xlu1 %v1170_v1  ;;  %328 = vperm.xlu0 %1144, %v292_v7  }
  0x15   : > { %332 = vperm.xlu1 %1145, %v293_v9   ;;  %v549_v16 = vmul.f32 -1e+30, %v547_v14  ;;  %v550_v18 = vmul.f32 -1e+30, %v548_v17 }
  0x18   : > { %488 = vrot.lane.b32.xlu0 %v294_v11, %s1172_s16 }
  0x19   : > { %1146 = vset.pattern.permute.xlu0 %v1173_v12 }
  0x1c   : > { %340 = vperm.xlu0 %1146, %v290_v0  }
  0x20   : > { %344 = vperm.xlu0 %1146, %v291_v3  }
  0x24   : > { %348 = vperm.xlu0 %1146, %v292_v7  }
  0x28   : > { %352 = vperm.xlu0 %1146, %v293_v9   ;;  %v498_v9 = vsub.s32 0, %v497_v2 }
  0x2c   : > { %1147 = vset.pattern.permute.xlu0 %v1170_v1  ;;  %v289_v1 = vld [vmem:[%s273_s25] sm:$0x1] }
  0x2d   : > { %537 = vperm.xlu0 %1147, %v287_v13   ;;  %v503_v7 = vsub.f32 1.0, %v289_v1  ;;  %v499_v17 = vrot.slane %v289_v1, %v498_v9 }
  0x2f   : > { %v504_v12 = vmul.f32 -1e+30, %v503_v7 }
  0x31   : > { %542 = vperm.xlu0 %1147, %v288_v15  }
  0x35   : > { %553 = vperm.xlu0 %1147, %v549_v16  }
  0x39   : > { %558 = vperm.xlu0 %1147, %v550_v18  }
  0x3e   : > { %373 = vxpose.xlu1.b32.start [1/4] (short) (narrow) %v1230_v4, 16 }
  0x42   : > { %374 = vxpose.xlu1.b32.cont [2/4] (short) (narrow) %v1232_v5, 16 }
  0x46   : > { %375 = vxpose.xlu1.b32.cont [3/4] (short) (narrow) %v1234_v6, 16 }
  0x4a   : > { %376 = vxpose.xlu1.b32.end [4/4] (short) (narrow) %v1248_v8, 16 }
  0x86   : > { %v321_v19 = vpop.permute.xlu1 %320  ;;  %v298_v20 = vpop.permute.xlu0 %297 }
  0x87   : > { %v315_v22 = vmul.f32 %v298_v20, %v1264_v10  ;;  %v509_v20 = vrot.slane %v504_v12, %v498_v9 }
  0x89   : > { %v335_v26 = vadd.f32 %v321_v19, %v315_v22 }
  0x8a   : > { %v325_v23 = vpop.permute.xlu1 %324  ;;  %v303_v24 = vpop.permute.xlu0 %302 }
  0x8b   : > { %v316_v25 = vmul.f32 %v303_v24, %v1278_v21 }
  0x8d   : > { %v336_v27 = vadd.f32 %v325_v23, %v316_v25 }
  0x8e   : > { %v308_v29 = vpop.permute.xlu0 %307 }
  0x8f   : > { %v313_v30 = vpop.permute.xlu1 %312  ;;  %v1102_v31 = vpack.c.bf16 %v336_v27, %v335_v26  ;;  %v317_v33 = vmul.f32 %v308_v29, %v1283_v28 }
  0x90   : > { %v318_v34 = vmul.f32 %v313_v30, %v1286_v32 }
  0x91   : > { %1103 = vmatprep.subr.bf16.mxu0 %v1102_v31 }
  0x92   : > { %1105 = vmatpush3.bf16.msra.mxu0 %v1102_v31 }
  0x93   : > { %v329_v35 = vpop.permute.xlu0 %328 }
  0x94   : > { %v333_v36 = vpop.permute.xlu1 %332  ;;  %v337_v37 = vadd.f32 %v329_v35, %v317_v33 }
  0x95   : > { %v338_v38 = vadd.f32 %v333_v36, %v318_v34 }
  0x97   : > { %v1106_v39 = vpack.c.bf16 %v338_v38, %v337_v37  ;;  %v489_v40 = vpop.permute.xlu0 %488 }
  0x98   : > { %1126 = vpush %v489_v40 }
  0x99   : > { %1107 = vmatprep.subr.bf16.mxu0 %v1106_v39 }
  0x9a   : > { %1109 = vmatpush3.bf16.msra.mxu0 %v1106_v39 }
  0x9b   : > { %v341_v43 = vpop.permute.xlu0 %340 }
  0x9c   : > { %v355_v46 = vmul.f32 %v341_v43, %v1264_v10 }
  0x9e   : > { %v360_v48 = vsel %vm359_vm1, %v355_v46, 0.0 }
  0x9f   : > { %v345_v44 = vpop.permute.xlu0 %344 }
  0xa0   : > { %v356_v47 = vmul.f32 %v345_v44, %v1278_v21 }
  0xa2   : > { %v361_v49 = vsel %vm359_vm1, %v356_v47, 0.0 }
  0xa3   : > { %v349_v45 = vpop.permute.xlu0 %348  ;;  %v362_v52 = vadd.f32 %v361_v49, %v360_v48 }
  0xa4   : > { %v357_v50 = vmul.f32 %v349_v45, %v1283_v28 }
  0xa6   : > { %v363_v53 = vsel %vm359_vm1, %v357_v50, 0.0 }
  0xa7   : > { %v353_v51 = vpop.permute.xlu0 %352  ;;  %v364_v55 = vadd.f32 %v363_v53, %v362_v52 }
  0xa8   : > { %v358_v54 = vmul.f32 %v353_v51, %v1286_v32 }
  0xaa   : > { %v365_v56 = vsel %vm359_vm1, %v358_v54, 0.0 }
  0xab   : > { %v366_v57 = vadd.f32 %v365_v56, %v364_v55 }
  0xac   : > { %v538_v60 = vpop.permute.xlu0 %537 }
  0xad   : > { %v367_v58 = vrot.slane %v366_v57, 4 }
  0xaf   : > { %v368_v59 = vadd.f32 %v367_v58, %v366_v57 }
  0xb0   : > { %v543_v0 = vpop.permute.xlu0 %542 }
  0xb1   : > { %v369_v61 = vrot.slane %v368_v59, 2 }
  0xb3   : > { %v370_v63 = vadd.f32 %v369_v61, %v368_v59 }
  0xb4   : > { %v554_v10 = vpop.permute.xlu0 %553 }
  0xb5   : > { %v371_v3 = vrot.slane %v370_v63, 1 }
  0xb7   : > { %v372_v11 = vadd.f32 %v371_v3, %v370_v63 }
  0xb8   : > { %v559_v23 = vpop.permute.xlu0 %558 }
  0xbe   : > { %v389_v41 = vpop.trf.xlu1 }
  0xbf   : > { %1069 = vmatprep.mubr.msk.f32.mxu0 %vm405_vm2, %v389_v41 }
  0xc2   : > { %v390_v42 = vpop.trf.xlu1 }
  0xc3   : > { %1070 = vmatmul.mubr.msk.f32.vlgmr.msra.gmra.mrb[0].mxu0 %vm405_vm2, %v390_v42 }
  0xc4   : > { %1086 = vmatprep.mubr.msk.f32.mxu0 %vm693_vm0, %v1230_v4 }
  0xc9   : > { %s1127_s26 = spop %1126 }
  0xca   : > { %v491_v14 = vstv %s1127_s26 }
 0x196   : > { %v1071_v13 = vpop.f32.mrb[0].mxu0 }
 0x197   : > { %v484_v15 = vadd.f32 %v1071_v13, %v372_v11  ;;  %v478_v16 = vpop.f32.mrb[1].mxu0 }
 0x198   : > { %v479_v18 = vadd.f32 %v478_v16, %v372_v11 }
 0x199   : > { %v494_v19 = vadd.f32 %v491_v14, %v484_v15 }
 0x19a   : > { %v493_v22 = vadd.f32 %v491_v14, %v479_v18 }
 0x19b   : > { %v502_v24 = vmul.f32 %v499_v17, %v494_v19  ;;  %v546_v25 = vmul.f32 %v543_v0, %v494_v19 }
 0x19c   : > { %v501_v26 = vmul.f32 %v499_v17, %v493_v22  ;;  %v545_v27 = vmul.f32 %v538_v60, %v493_v22 }
 0x19d   : > { %v562_v29 = vadd.f32 %v559_v23, %v546_v25  ;;  %v512_v30 = vadd.f32 %v509_v20, %v502_v24 }
 0x19e   : > { %v561_v31 = vadd.f32 %v554_v10, %v545_v27  ;;  %v511_v33 = vadd.f32 %v509_v20, %v501_v26 }
 0x19f   : > { %v564_v34 = vsel %vm359_vm1, %v562_v29, -inf  ;;  %v516_v35 = vsel %vm359_vm1, %v512_v30, -inf }
 0x1a0   : > { %v563_v36 = vsel %vm359_vm1, %v561_v31, -inf  ;;  %517 = vmax.xlane.f32.xlu1 %v516_v35  ;;  %v513_v37 = vsel %vm359_vm1, %v511_v33, -inf }
 0x1a1   : > { %v565_v38 = vmax.f32 %v563_v36, %v564_v34  ;;  %514 = vmax.xlane.f32.xlu0 %v513_v37 }
 0x1a3   : > { %v566_v39 = vrot.slane %v565_v38, 4 }
 0x1a5   : > { %v567_v40 = vmax.f32 %v565_v38, %v566_v39 }
 0x1a7   : > { %v568_v41 = vrot.slane %v567_v40, 2 }
 0x1a9   : > { %v569_v42 = vmax.f32 %v567_v40, %v568_v41 }
 0x1ab   : > { %v570_v43 = vrot.slane %v569_v42, 1 }
 0x1ad   : > { %v571_v44 = vmax.f32 %v569_v42, %v570_v43 }
 0x1af   : > { %v572_v45 = vsub.f32 %v561_v31, %v571_v44  ;;  %v573_v46 = vsub.f32 %v562_v29, %v571_v44 }
 0x1b1   : > { %v574_v47 = vmul.f32 1.442695, %v572_v45  ;;  %v576_v48 = vmul.f32 1.442695, %v573_v46 }
 0x1b3   : > { %1148 = vpow2.f32 %v574_v47 }
 0x1b4   : > { %1150 = vpow2.f32 %v576_v48 }
 0x1bd   : > { %v1149_v49 = vpop.eup %1148 }
 0x1be   : > { %v1151_v50 = vpop.eup %1150  ;;  %v578_v51 = vsel %vm359_vm1, %v1149_v49, 0.0 }
 0x1bf   : > { %v579_v52 = vsel %vm359_vm1, %v1151_v50, 0.0 }
 0x1c0   : > { %v580_v53 = vadd.f32 %v579_v52, %v578_v51 }
 0x1c2   : > { %v581_v54 = vrot.slane %v580_v53, 4 }
 0x1c4   : > { %v582_v55 = vadd.f32 %v581_v54, %v580_v53 }
 0x1c6   : > { %v583_v56 = vrot.slane %v582_v55, 2 }
 0x1c8   : > { %v584_v57 = vadd.f32 %v583_v56, %v582_v55 }
 0x1ca   : > { %v585_v58 = vrot.slane %v584_v57, 1 }
 0x1cc   : > { %v586_v59 = vadd.f32 %v585_v58, %v584_v57 }
 0x1ce   : > { %1152 = vrcp.f32 %v586_v59 }
 0x1d8   : > { %v1153_v60 = vpop.eup %1152 }
 0x1d9   : > { %v588_v61 = vmul.f32 %v1153_v60, %v1149_v49  ;;  %v589_v62 = vmul.f32 %v1153_v60, %v1151_v50 }
 0x1db   : > { %v1116_v63 = vpack.c.bf16 %v589_v62, %v588_v61 }
 0x1dd   : > { %1117 = vmatprep.subr.bf16.mxu0 %v1116_v63 }
 0x1de   : > { %1119 = vmatpush3.bf16.msra.mxu0 %v1116_v63 }
 0x1e1   : > { %1087 = vmatmul.mubr.msk.f32.vlgmr.msra.gmra.mrb[2].mxu0 %vm693_vm0, %v1232_v5 }
 0x1e2   : > { %1089 = vmatprep.mubr.msk.f32.mxu0 %vm693_vm0, %v1234_v6 }
 0x1e5   : > { %1090 = vmatmul.mubr.msk.f32.gmra.mrb[4].mxu0 %vm693_vm0, %v1248_v8 }
 0x22d   : > { %v518_v0 = vpop.xlane.xlu1 %517 }
 0x22e   : > { %v520_v1 = vsub.f32 %v512_v30, %v518_v0  ;;  %v515_v2 = vpop.xlane.xlu0 %514 }
 0x22f   : > { %v519_v3 = vsub.f32 %v511_v33, %v515_v2 }
 0x230   : > { %v523_v7 = vmul.f32 1.442695, %v520_v1 }
 0x231   : > { %v521_v9 = vmul.f32 1.442695, %v519_v3 }
 0x233   : > { %1154 = vpow2.f32 %v521_v9 }
 0x234   : > { %1156 = vpow2.f32 %v523_v7 }
 0x23d   : > { %v1155_v10 = vpop.eup %1154 }
 0x23e   : > { %v525_v11 = vsel %vm359_vm1, %v1155_v10, 0.0  ;;  %v1157_v12 = vpop.eup %1156 }
 0x23f   : > { %526 = vadd.xlane.f32.xlu0 %v525_v11  ;;  %v528_v13 = vsel %vm359_vm1, %v1157_v12, 0.0 }
 0x243   : > { %529 = vadd.xlane.f32.xlu0 %v528_v13 }
 0x2b4   : > { %v1088_v14 = vpop.f32.mrb[2].mxu0 }
 0x2b5   : > { %v772_v15 = vpop.f32.mrb[3].mxu0 }
 0x2b8   : > { %v1091_v16 = vpop.f32.mrb[4].mxu0 }
 0x2b9   : > { %v782_v17 = vpop.f32.mrb[5].mxu0 }
 0x2cc   : > { %v527_v18 = vpop.xlane.xlu0 %526 }
 0x2cd   : > { %1158 = vrcp.f32 %v527_v18 }
 0x2d0   : > { %v530_v19 = vpop.xlane.xlu0 %529 }
 0x2d1   : > { %1160 = vrcp.f32 %v530_v19 }
 0x2d7   : > { %v1159_v20 = vpop.eup %1158 }
 0x2d8   : > { %v532_v23 = vmul.f32 %v1159_v20, %v1155_v10 }
 0x2db   : > { %v1161_v22 = vpop.eup %1160 }
 0x2dc   : > { %v534_v24 = vmul.f32 %v1161_v22, %v1157_v12 }
 0x2de   : > { %v1110_v25 = vpack.c.bf16 %v534_v24, %v532_v23 }
 0x2e0   : > { %1112 = vmatprep.subr.msk.bf16.mxu1 %vm1111_vm3, %v1110_v25 }
 0x2e1   : > { %1115 = vmatpush3.bf16.xpose.msk.msra.mxu1 %vm1111_vm3, %v1110_v25 }
 0x2e2   : > { %1122 = vmatprep.subr.msk.bf16.mxu1 %vm1111_vm3, %v1110_v25 }
 0x2e8   : > { %1077 = vmatmul.mubr.msk.f32.vlgmr.msra.gmra.mrb[0].mxu1 %vm359_vm1, %v1278_v21 }
 0x2e9   : > { %1125 = vmatpush3.bf16.xpose.msk.msra.mxu1 %vm1111_vm3, %v1110_v25  ;;  %1079 = vmatprep.mubr.msk.f32.mxu1 %vm359_vm1, %v1283_v28 }
 0x2ec   : > { %1080 = vmatmul.mubr.msk.f32.gmra.mrb[2].mxu1 %vm359_vm1, %v1286_v32 }
 0x2ed   : > { %1096 = vmatprep.mubr.msk.f32.mxu1 %vm359_vm1, %v772_v15 }
 0x2f0   : > { %1097 = vmatmul.mubr.msk.f32.vlgmr.msra.gmra.mrb[4].mxu1 %vm359_vm1, %v1088_v14 }
 0x2f1   : > { %1099 = vmatprep.mubr.msk.f32.mxu1 %vm359_vm1, %v782_v17 }
 0x2f4   : > { %1100 = vmatmul.mubr.msk.f32.gmra.mrb[6].mxu1 %vm359_vm1, %v1091_v16 }
 0x3bb   : > { %v1078_v21 = vpop.f32.mrb[0].mxu1 }
 0x3bc   : > { %v889_v26 = vmul.f32 %v1078_v21, %v1232_v5  ;;  %901 = vst.msk [vmem:[%s1228_s6 + $0x28] sm:$0xff] %vm693_vm0, %v1078_v21  ;;  %v674_v28 = vpop.f32.mrb[1].mxu1 }
 0x3bd   : > { %v888_v27 = vmul.f32 %v674_v28, %v1230_v4  ;;  %900 = vst.msk [vmem:[%s1228_s6 + $0x20] sm:$0xff] %vm693_vm0, %v674_v28 }
 0x3be   : > { %905 = vst.msk [vmem:[%s1228_s6 + $0x48] sm:$0xff] %vm693_vm0, %v889_v26 }
 0x3bf   : > { %904 = vst.msk [vmem:[%s1228_s6 + $0x40] sm:$0xff] %vm693_vm0, %v888_v27  ;;  %v1081_v32 = vpop.f32.mrb[2].mxu1 }
 0x3c0   : > { %v891_v29 = vmul.f32 %v1081_v32, %v1248_v8  ;;  %903 = vst.msk [vmem:[%s1228_s6 + $0x38] sm:$0xff] %vm693_vm0, %v1081_v32  ;;  %v684_v30 = vpop.f32.mrb[3].mxu1 }
 0x3c1   : > { %v890_v31 = vmul.f32 %v684_v30, %v1234_v6  ;;  %902 = vst.msk [vmem:[%s1228_s6 + $0x30] sm:$0xff] %vm693_vm0, %v684_v30 }
 0x3c2   : > { %907 = vst.msk [vmem:[%s1228_s6 + $0x58] sm:$0xff] %vm693_vm0, %v891_v29 }
 0x3c3   : > { %906 = vst.msk [vmem:[%s1228_s6 + $0x50] sm:$0xff] %vm693_vm0, %v890_v31  ;;  %v1098_v33 = vpop.f32.mrb[4].mxu1 }
 0x3c4   : > { %v893_v34 = vmul.f32 %v1098_v33, %v1232_v5  ;;  %v869_v35 = vpop.f32.mrb[5].mxu1 }
 0x3c5   : > { %v892_v36 = vmul.f32 %v869_v35, %v1230_v4 }
 0x3c6   : > { %909 = vst.msk [vmem:[%s1228_s6 + $0x68] sm:$0xff] %vm693_vm0, %v893_v34 }
 0x3c7   : > { %908 = vst.msk [vmem:[%s1228_s6 + $0x60] sm:$0xff] %vm693_vm0, %v892_v36  ;;  %v1101_v37 = vpop.f32.mrb[6].mxu1 }
 0x3c8   : > { %v895_v38 = vmul.f32 %v1101_v37, %v1248_v8  ;;  %v879_v39 = vpop.f32.mrb[7].mxu1 }
 0x3c9   : > { %v894_v40 = vmul.f32 %v879_v39, %v1234_v6 }
 0x3ca   : > { %911 = vst.msk [vmem:[%s1228_s6 + $0x78] sm:$0xff] %vm693_vm0, %v895_v38 }
 0x3cb   : > { %910 = vst.msk [vmem:[%s1228_s6 + $0x70] sm:$0xff] %vm693_vm0, %v894_v40 }
 0x3cc PF: > { %s15_s18 = sadd.s32 1, %s1168_s18  }
 0x3cd   : > { %p12_p4 = scmp.ge.s32.totalorder %s15_s18, 4  }
 0x3cf   :  { %14 = sbr.rel (!%p12_p4) target bundleno = 1 (0x1), region = 79 }

</bundles_post_ra>
